<compile_context>
chip_gen: v5e
topology: v5e:2x2
jax: 0.10.0
libtpu: 0.0.40
codegen_flags: <defaults>
</compile_context>

<pallas_src>
import jax
import jax.numpy as jnp
from jax.experimental import pallas as pl
from jax.experimental.pallas import tpu as pltpu

# ----------------------------- model sizes (small, synthetic) ----------------
N_CLASS = 16    # vocab / one-hot size
N_HIDDEN = 32   # LSTM hidden size
SEQ_LEN = 8
BATCH = 4


def bilstm_kernel(x_ref,        # (T*B, C)   time-major, flattened
                  wih_ref,      # (C, 8H)    [Wih_f | Wih_b], transposed
                  b_ref,        # (1, 8H)    [b_f | b_b], b_ih+b_hh folded
                  whh_ref,      # (H, 4H)    forward-direction recurrent weight
                  wout_ref,     # (2H, C)    final linear weight, transposed
                  bout_ref,     # (1, C)
                  out_ref):     # (B, C)
    TB, _ = x_ref.shape
    H = whh_ref.shape[0]
    B = out_ref.shape[0]
    T = TB // B

    # ---- one fused input projection for BOTH directions, biases folded ------
    gx = (jnp.dot(x_ref[...], wih_ref[...], preferred_element_type=jnp.float32)
          + b_ref[...])                                   # (T*B, 8H)

    # ---- backward direction (before the forward loop, overlaps its prologue) -
    # Zero initial state => h@Whh_b == 0 and f*c == 0, so a single elementwise
    # step on the precomputed gates at t = T-1 gives outputs[-1][:, H:].
    gb = gx[(T - 1) * B:T * B, 4 * H:8 * H]               # (B, 4H) backward gates
    i_b = jax.nn.sigmoid(gb[:, 0 * H:1 * H])
    g_b = jnp.tanh(gb[:, 2 * H:3 * H])
    o_b = jax.nn.sigmoid(gb[:, 3 * H:4 * H])
    h_bwd = o_b * jnp.tanh(i_b * g_b)

    # ---- forward direction: fully unrolled recurrence, state kept in vregs ---
    whh = whh_ref[...]                                    # hoisted weight load
    h = jnp.zeros((B, H), jnp.float32)
    c = jnp.zeros((B, H), jnp.float32)
    for t in range(T):                                    # T is static -> full unroll
        gates = (gx[t * B:(t + 1) * B, 0:4 * H]
                 + jnp.dot(h, whh, preferred_element_type=jnp.float32))  # (B, 4H)
        # full-width nonlinearities (EUP has slack), then sub-lane slices
        sig = jax.nn.sigmoid(gates)
        th = jnp.tanh(gates)
        i = sig[:, 0 * H:1 * H]
        f = sig[:, 1 * H:2 * H]
        g = th[:, 2 * H:3 * H]
        o = sig[:, 3 * H:4 * H]
        c = f * c + i * g
        h = o * jnp.tanh(c)

    # ---- final linear: concat(h_fwd, h_bwd) @ W.T + b (split to avoid concat)
    wout = wout_ref[...]
    out = (jnp.dot(h, wout[:H, :], preferred_element_type=jnp.float32)
           + jnp.dot(h_bwd, wout[H:, :], preferred_element_type=jnp.float32)
           + bout_ref[...])
    out_ref[...] = out.astype(out_ref.dtype)


def bilstm_forward(X, params):
    """X: (batch, seq_len, n_class) float32 -> (batch, n_class) float32."""
    B, T, C = X.shape

    # time-major reorder + flatten once in the wrapper: (T*B, C) slab
    x2d = jnp.transpose(X, (1, 0, 2)).reshape(T * B, C)
    # fuse both directions' input weights / biases so the kernel does one matmul
    wih_cat = jnp.concatenate([params["wih_f"], params["wih_b"]], axis=1)  # (C, 8H)
    b_cat = jnp.concatenate([params["b_f"], params["b_b"]], axis=1)        # (1, 8H)

    vmem = pl.BlockSpec(memory_space=pltpu.MemorySpace.VMEM)
    return pl.pallas_call(
        bilstm_kernel,
        out_shape=jax.ShapeDtypeStruct((B, C), jnp.float32),
        in_specs=[vmem] * 6,
        out_specs=vmem,
    )(x2d, wih_cat, b_cat, params["whh_f"], params["wout"], params["bout"])


def init_params(key, n_class=N_CLASS, n_hidden=N_HIDDEN):
    """Deterministic synthetic parameters (PyTorch-like uniform init)."""
    ks = jax.random.split(key, 8)
    s = 1.0 / jnp.sqrt(jnp.float32(n_hidden))
    u = lambda k, shape: jax.random.uniform(k, shape, jnp.float32, -s, s)
    return {
        # stored transposed: x @ wih, h @ whh ; gate order [i, f, g, o]
        "wih_f": u(ks[0], (n_class, 4 * n_hidden)),
        "whh_f": u(ks[1], (n_hidden, 4 * n_hidden)),
        "b_f":   u(ks[2], (1, 4 * n_hidden)),          # b_ih + b_hh folded
        "wih_b": u(ks[3], (n_class, 4 * n_hidden)),
        "whh_b": u(ks[4], (n_hidden, 4 * n_hidden)),   # only needed by reference
        "b_b":   u(ks[5], (1, 4 * n_hidden)),
        "wout":  u(ks[6], (2 * n_hidden, n_class)),    # W of Linear, transposed
        "bout":  jnp.ones((1, n_class), jnp.float32),  # self.b = torch.ones(n_class)
    }


# ------------------------------ pure-JAX reference ---------------------------
def _reference(X, p):
    """Full bidirectional LSTM (both directions over the whole sequence),
    take outputs[-1], apply the linear head — mirrors the PyTorch module."""
    B, T, C = X.shape
    H = p["whh_f"].shape[0]
    x_tm = jnp.transpose(X, (1, 0, 2))

    def cell(x_t, h, c, wih, whh, b):
        g = x_t @ wih + h @ whh + b
        i, f, gg, o = (jax.nn.sigmoid(g[:, :H]), jax.nn.sigmoid(g[:, H:2 * H]),
                       jnp.tanh(g[:, 2 * H:3 * H]), jax.nn.sigmoid(g[:, 3 * H:]))
        c_n = f * c + i * gg
        return o * jnp.tanh(c_n), c_n

    # forward direction
    h = c = jnp.zeros((B, H), jnp.float32)
    for t in range(T):
        h, c = cell(x_tm[t], h, c, p["wih_f"], p["whh_f"], p["b_f"])
    h_fwd_last = h

    # backward direction: processes t = T-1 .. 0; keep its output at t = T-1
    hb = cb = jnp.zeros((B, H), jnp.float32)
    out_b_last = None
    for t in range(T - 1, -1, -1):
        hb, cb = cell(x_tm[t], hb, cb, p["wih_b"], p["whh_b"], p["b_b"])
        if t == T - 1:
            out_b_last = hb

    return jnp.concatenate([h_fwd_last, out_b_last], -1) @ p["wout"] + p["bout"]


if __name__ == "__main__":
    key = jax.random.PRNGKey(0)
    k_x, k_p = jax.random.split(key)
    X = jax.random.normal(k_x, (BATCH, SEQ_LEN, N_CLASS), jnp.float32)
    params = init_params(k_p)

    out = bilstm_forward(X, params)
    out = jax.block_until_ready(out)

    ref = _reference(X, params)
    assert out.shape == (BATCH, N_CLASS)
    assert jnp.max(jnp.abs(out - ref)) < 1e-4, "Pallas kernel mismatch vs JAX reference"

    print("KERNEL_OK")
</pallas_src>

<mosaic_0001>
module attributes {stable_mosaic.version = 11 : i64} {
  func.func @bilstm_kernel(%arg0: memref<32x16xf32, #tpu.memory_space<vmem>>, %arg1: memref<16x256xf32, #tpu.memory_space<vmem>>, %arg2: memref<1x256xf32, #tpu.memory_space<vmem>>, %arg3: memref<32x128xf32, #tpu.memory_space<vmem>>, %arg4: memref<64x16xf32, #tpu.memory_space<vmem>>, %arg5: memref<1x16xf32, #tpu.memory_space<vmem>>, %arg6: memref<4x16xf32, #tpu.memory_space<vmem>>) attributes {dimension_semantics = [], scalar_prefetch = 0 : i64, scratch_operands = 0 : i64, tpu.core_type = #tpu.core_type<tc>} {
    %c0 = arith.constant 0 : index
    %c0_0 = arith.constant 0 : index
    %0 = vector.load %arg0[%c0, %c0_0] : memref<32x16xf32, #tpu.memory_space<vmem>>, vector<32x16xf32>
    %c0_1 = arith.constant 0 : index
    %c0_2 = arith.constant 0 : index
    %1 = vector.load %arg1[%c0_1, %c0_2] : memref<16x256xf32, #tpu.memory_space<vmem>>, vector<16x256xf32>
    %cst = arith.constant dense<0.000000e+00> : vector<32x256xf32>
    %2 = tpu.matmul %0, %1, %cst {dimension_numbers = #tpu.dot_dimension_numbers<[1], [0], [0], [1], [0, 0, 1, 1], [], []>} : vector<32x16xf32>, vector<16x256xf32>, vector<32x256xf32> -> vector<32x256xf32>
    %c0_3 = arith.constant 0 : index
    %c0_4 = arith.constant 0 : index
    %3 = vector.load %arg2[%c0_3, %c0_4] : memref<1x256xf32, #tpu.memory_space<vmem>>, vector<1x256xf32>
    %4 = vector.broadcast %3 : vector<1x256xf32> to vector<32x256xf32>
    %5 = arith.addf %2, %4 : vector<32x256xf32>
    %6 = vector.extract_strided_slice %5 {offsets = [28, 128], sizes = [4, 128], strides = [1, 1]} : vector<32x256xf32> to vector<4x128xf32>
    %7 = vector.extract_strided_slice %6 {offsets = [0, 0], sizes = [4, 32], strides = [1, 1]} : vector<4x128xf32> to vector<4x32xf32>
    %8 = arith.negf %7 : vector<4x32xf32>
    %9 = math.exp %8 : vector<4x32xf32>
    %cst_5 = arith.constant 1.000000e+00 : f32
    %10 = vector.broadcast %cst_5 : f32 to vector<4x32xf32>
    %11 = arith.addf %10, %9 : vector<4x32xf32>
    %12 = arith.divf %10, %11 : vector<4x32xf32>
    %13 = vector.extract_strided_slice %6 {offsets = [0, 64], sizes = [4, 32], strides = [1, 1]} : vector<4x128xf32> to vector<4x32xf32>
    %14 = math.tanh %13 : vector<4x32xf32>
    %15 = vector.extract_strided_slice %6 {offsets = [0, 96], sizes = [4, 32], strides = [1, 1]} : vector<4x128xf32> to vector<4x32xf32>
    %16 = arith.negf %15 : vector<4x32xf32>
    %17 = math.exp %16 : vector<4x32xf32>
    %cst_6 = arith.constant 1.000000e+00 : f32
    %18 = vector.broadcast %cst_6 : f32 to vector<4x32xf32>
    %19 = arith.addf %18, %17 : vector<4x32xf32>
    %20 = arith.divf %18, %19 : vector<4x32xf32>
    %21 = arith.mulf %12, %14 : vector<4x32xf32>
    %22 = math.tanh %21 : vector<4x32xf32>
    %23 = arith.mulf %20, %22 : vector<4x32xf32>
    %c0_7 = arith.constant 0 : index
    %c0_8 = arith.constant 0 : index
    %24 = vector.load %arg3[%c0_7, %c0_8] : memref<32x128xf32, #tpu.memory_space<vmem>>, vector<32x128xf32>
    %cst_9 = arith.constant 0.000000e+00 : f32
    %25 = vector.broadcast %cst_9 : f32 to vector<4x32xf32>
    %cst_10 = arith.constant 0.000000e+00 : f32
    %26 = vector.broadcast %cst_10 : f32 to vector<4x32xf32>
    %27 = vector.extract_strided_slice %5 {offsets = [0, 0], sizes = [4, 128], strides = [1, 1]} : vector<32x256xf32> to vector<4x128xf32>
    %cst_11 = arith.constant dense<0.000000e+00> : vector<4x128xf32>
    %28 = tpu.matmul %25, %24, %cst_11 {dimension_numbers = #tpu.dot_dimension_numbers<[1], [0], [0], [1], [0, 0, 1, 1], [], []>} : vector<4x32xf32>, vector<32x128xf32>, vector<4x128xf32> -> vector<4x128xf32>
    %29 = arith.addf %27, %28 : vector<4x128xf32>
    %30 = arith.negf %29 : vector<4x128xf32>
    %31 = math.exp %30 : vector<4x128xf32>
    %cst_12 = arith.constant 1.000000e+00 : f32
    %32 = vector.broadcast %cst_12 : f32 to vector<4x128xf32>
    %33 = arith.addf %32, %31 : vector<4x128xf32>
    %34 = arith.divf %32, %33 : vector<4x128xf32>
    %35 = math.tanh %29 : vector<4x128xf32>
    %36 = vector.extract_strided_slice %34 {offsets = [0, 0], sizes = [4, 32], strides = [1, 1]} : vector<4x128xf32> to vector<4x32xf32>
    %37 = vector.extract_strided_slice %34 {offsets = [0, 32], sizes = [4, 32], strides = [1, 1]} : vector<4x128xf32> to vector<4x32xf32>
    %38 = vector.extract_strided_slice %35 {offsets = [0, 64], sizes = [4, 32], strides = [1, 1]} : vector<4x128xf32> to vector<4x32xf32>
    %39 = vector.extract_strided_slice %34 {offsets = [0, 96], sizes = [4, 32], strides = [1, 1]} : vector<4x128xf32> to vector<4x32xf32>
    %40 = arith.mulf %37, %26 : vector<4x32xf32>
    %41 = arith.mulf %36, %38 : vector<4x32xf32>
    %42 = arith.addf %40, %41 : vector<4x32xf32>
    %43 = math.tanh %42 : vector<4x32xf32>
    %44 = arith.mulf %39, %43 : vector<4x32xf32>
    %45 = vector.extract_strided_slice %5 {offsets = [4, 0], sizes = [4, 128], strides = [1, 1]} : vector<32x256xf32> to vector<4x128xf32>
    %cst_13 = arith.constant dense<0.000000e+00> : vector<4x128xf32>
    %46 = tpu.matmul %44, %24, %cst_13 {dimension_numbers = #tpu.dot_dimension_numbers<[1], [0], [0], [1], [0, 0, 1, 1], [], []>} : vector<4x32xf32>, vector<32x128xf32>, vector<4x128xf32> -> vector<4x128xf32>
    %47 = arith.addf %45, %46 : vector<4x128xf32>
    %48 = arith.negf %47 : vector<4x128xf32>
    %49 = math.exp %48 : vector<4x128xf32>
    %cst_14 = arith.constant 1.000000e+00 : f32
    %50 = vector.broadcast %cst_14 : f32 to vector<4x128xf32>
    %51 = arith.addf %50, %49 : vector<4x128xf32>
    %52 = arith.divf %50, %51 : vector<4x128xf32>
    %53 = math.tanh %47 : vector<4x128xf32>
    %54 = vector.extract_strided_slice %52 {offsets = [0, 0], sizes = [4, 32], strides = [1, 1]} : vector<4x128xf32> to vector<4x32xf32>
    %55 = vector.extract_strided_slice %52 {offsets = [0, 32], sizes = [4, 32], strides = [1, 1]} : vector<4x128xf32> to vector<4x32xf32>
    %56 = vector.extract_strided_slice %53 {offsets = [0, 64], sizes = [4, 32], strides = [1, 1]} : vector<4x128xf32> to vector<4x32xf32>
    %57 = vector.extract_strided_slice %52 {offsets = [0, 96], sizes = [4, 32], strides = [1, 1]} : vector<4x128xf32> to vector<4x32xf32>
    %58 = arith.mulf %55, %42 : vector<4x32xf32>
    %59 = arith.mulf %54, %56 : vector<4x32xf32>
    %60 = arith.addf %58, %59 : vector<4x32xf32>
    %61 = math.tanh %60 : vector<4x32xf32>
    %62 = arith.mulf %57, %61 : vector<4x32xf32>
    %63 = vector.extract_strided_slice %5 {offsets = [8, 0], sizes = [4, 128], strides = [1, 1]} : vector<32x256xf32> to vector<4x128xf32>
    %cst_15 = arith.constant dense<0.000000e+00> : vector<4x128xf32>
    %64 = tpu.matmul %62, %24, %cst_15 {dimension_numbers = #tpu.dot_dimension_numbers<[1], [0], [0], [1], [0, 0, 1, 1], [], []>} : vector<4x32xf32>, vector<32x128xf32>, vector<4x128xf32> -> vector<4x128xf32>
    %65 = arith.addf %63, %64 : vector<4x128xf32>
    %66 = arith.negf %65 : vector<4x128xf32>
    %67 = math.exp %66 : vector<4x128xf32>
    %cst_16 = arith.constant 1.000000e+00 : f32
    %68 = vector.broadcast %cst_16 : f32 to vector<4x128xf32>
    %69 = arith.addf %68, %67 : vector<4x128xf32>
    %70 = arith.divf %68, %69 : vector<4x128xf32>
    %71 = math.tanh %65 : vector<4x128xf32>
    %72 = vector.extract_strided_slice %70 {offsets = [0, 0], sizes = [4, 32], strides = [1, 1]} : vector<4x128xf32> to vector<4x32xf32>
    %73 = vector.extract_strided_slice %70 {offsets = [0, 32], sizes = [4, 32], strides = [1, 1]} : vector<4x128xf32> to vector<4x32xf32>
    %74 = vector.extract_strided_slice %71 {offsets = [0, 64], sizes = [4, 32], strides = [1, 1]} : vector<4x128xf32> to vector<4x32xf32>
    %75 = vector.extract_strided_slice %70 {offsets = [0, 96], sizes = [4, 32], strides = [1, 1]} : vector<4x128xf32> to vector<4x32xf32>
    %76 = arith.mulf %73, %60 : vector<4x32xf32>
    %77 = arith.mulf %72, %74 : vector<4x32xf32>
    %78 = arith.addf %76, %77 : vector<4x32xf32>
    %79 = math.tanh %78 : vector<4x32xf32>
    %80 = arith.mulf %75, %79 : vector<4x32xf32>
    %81 = vector.extract_strided_slice %5 {offsets = [12, 0], sizes = [4, 128], strides = [1, 1]} : vector<32x256xf32> to vector<4x128xf32>
    %cst_17 = arith.constant dense<0.000000e+00> : vector<4x128xf32>
    %82 = tpu.matmul %80, %24, %cst_17 {dimension_numbers = #tpu.dot_dimension_numbers<[1], [0], [0], [1], [0, 0, 1, 1], [], []>} : vector<4x32xf32>, vector<32x128xf32>, vector<4x128xf32> -> vector<4x128xf32>
    %83 = arith.addf %81, %82 : vector<4x128xf32>
    %84 = arith.negf %83 : vector<4x128xf32>
    %85 = math.exp %84 : vector<4x128xf32>
    %cst_18 = arith.constant 1.000000e+00 : f32
    %86 = vector.broadcast %cst_18 : f32 to vector<4x128xf32>
    %87 = arith.addf %86, %85 : vector<4x128xf32>
    %88 = arith.divf %86, %87 : vector<4x128xf32>
    %89 = math.tanh %83 : vector<4x128xf32>
    %90 = vector.extract_strided_slice %88 {offsets = [0, 0], sizes = [4, 32], strides = [1, 1]} : vector<4x128xf32> to vector<4x32xf32>
    %91 = vector.extract_strided_slice %88 {offsets = [0, 32], sizes = [4, 32], strides = [1, 1]} : vector<4x128xf32> to vector<4x32xf32>
    %92 = vector.extract_strided_slice %89 {offsets = [0, 64], sizes = [4, 32], strides = [1, 1]} : vector<4x128xf32> to vector<4x32xf32>
    %93 = vector.extract_strided_slice %88 {offsets = [0, 96], sizes = [4, 32], strides = [1, 1]} : vector<4x128xf32> to vector<4x32xf32>
    %94 = arith.mulf %91, %78 : vector<4x32xf32>
    %95 = arith.mulf %90, %92 : vector<4x32xf32>
    %96 = arith.addf %94, %95 : vector<4x32xf32>
    %97 = math.tanh %96 : vector<4x32xf32>
    %98 = arith.mulf %93, %97 : vector<4x32xf32>
    %99 = vector.extract_strided_slice %5 {offsets = [16, 0], sizes = [4, 128], strides = [1, 1]} : vector<32x256xf32> to vector<4x128xf32>
    %cst_19 = arith.constant dense<0.000000e+00> : vector<4x128xf32>
    %100 = tpu.matmul %98, %24, %cst_19 {dimension_numbers = #tpu.dot_dimension_numbers<[1], [0], [0], [1], [0, 0, 1, 1], [], []>} : vector<4x32xf32>, vector<32x128xf32>, vector<4x128xf32> -> vector<4x128xf32>
    %101 = arith.addf %99, %100 : vector<4x128xf32>
    %102 = arith.negf %101 : vector<4x128xf32>
    %103 = math.exp %102 : vector<4x128xf32>
    %cst_20 = arith.constant 1.000000e+00 : f32
    %104 = vector.broadcast %cst_20 : f32 to vector<4x128xf32>
    %105 = arith.addf %104, %103 : vector<4x128xf32>
    %106 = arith.divf %104, %105 : vector<4x128xf32>
    %107 = math.tanh %101 : vector<4x128xf32>
    %108 = vector.extract_strided_slice %106 {offsets = [0, 0], sizes = [4, 32], strides = [1, 1]} : vector<4x128xf32> to vector<4x32xf32>
    %109 = vector.extract_strided_slice %106 {offsets = [0, 32], sizes = [4, 32], strides = [1, 1]} : vector<4x128xf32> to vector<4x32xf32>
    %110 = vector.extract_strided_slice %107 {offsets = [0, 64], sizes = [4, 32], strides = [1, 1]} : vector<4x128xf32> to vector<4x32xf32>
    %111 = vector.extract_strided_slice %106 {offsets = [0, 96], sizes = [4, 32], strides = [1, 1]} : vector<4x128xf32> to vector<4x32xf32>
    %112 = arith.mulf %109, %96 : vector<4x32xf32>
    %113 = arith.mulf %108, %110 : vector<4x32xf32>
    %114 = arith.addf %112, %113 : vector<4x32xf32>
    %115 = math.tanh %114 : vector<4x32xf32>
    %116 = arith.mulf %111, %115 : vector<4x32xf32>
    %117 = vector.extract_strided_slice %5 {offsets = [20, 0], sizes = [4, 128], strides = [1, 1]} : vector<32x256xf32> to vector<4x128xf32>
    %cst_21 = arith.constant dense<0.000000e+00> : vector<4x128xf32>
    %118 = tpu.matmul %116, %24, %cst_21 {dimension_numbers = #tpu.dot_dimension_numbers<[1], [0], [0], [1], [0, 0, 1, 1], [], []>} : vector<4x32xf32>, vector<32x128xf32>, vector<4x128xf32> -> vector<4x128xf32>
    %119 = arith.addf %117, %118 : vector<4x128xf32>
    %120 = arith.negf %119 : vector<4x128xf32>
    %121 = math.exp %120 : vector<4x128xf32>
    %cst_22 = arith.constant 1.000000e+00 : f32
    %122 = vector.broadcast %cst_22 : f32 to vector<4x128xf32>
    %123 = arith.addf %122, %121 : vector<4x128xf32>
    %124 = arith.divf %122, %123 : vector<4x128xf32>
    %125 = math.tanh %119 : vector<4x128xf32>
    %126 = vector.extract_strided_slice %124 {offsets = [0, 0], sizes = [4, 32], strides = [1, 1]} : vector<4x128xf32> to vector<4x32xf32>
    %127 = vector.extract_strided_slice %124 {offsets = [0, 32], sizes = [4, 32], strides = [1, 1]} : vector<4x128xf32> to vector<4x32xf32>
    %128 = vector.extract_strided_slice %125 {offsets = [0, 64], sizes = [4, 32], strides = [1, 1]} : vector<4x128xf32> to vector<4x32xf32>
    %129 = vector.extract_strided_slice %124 {offsets = [0, 96], sizes = [4, 32], strides = [1, 1]} : vector<4x128xf32> to vector<4x32xf32>
    %130 = arith.mulf %127, %114 : vector<4x32xf32>
    %131 = arith.mulf %126, %128 : vector<4x32xf32>
    %132 = arith.addf %130, %131 : vector<4x32xf32>
    %133 = math.tanh %132 : vector<4x32xf32>
    %134 = arith.mulf %129, %133 : vector<4x32xf32>
    %135 = vector.extract_strided_slice %5 {offsets = [24, 0], sizes = [4, 128], strides = [1, 1]} : vector<32x256xf32> to vector<4x128xf32>
    %cst_23 = arith.constant dense<0.000000e+00> : vector<4x128xf32>
    %136 = tpu.matmul %134, %24, %cst_23 {dimension_numbers = #tpu.dot_dimension_numbers<[1], [0], [0], [1], [0, 0, 1, 1], [], []>} : vector<4x32xf32>, vector<32x128xf32>, vector<4x128xf32> -> vector<4x128xf32>
    %137 = arith.addf %135, %136 : vector<4x128xf32>
    %138 = arith.negf %137 : vector<4x128xf32>
    %139 = math.exp %138 : vector<4x128xf32>
    %cst_24 = arith.constant 1.000000e+00 : f32
    %140 = vector.broadcast %cst_24 : f32 to vector<4x128xf32>
    %141 = arith.addf %140, %139 : vector<4x128xf32>
    %142 = arith.divf %140, %141 : vector<4x128xf32>
    %143 = math.tanh %137 : vector<4x128xf32>
    %144 = vector.extract_strided_slice %142 {offsets = [0, 0], sizes = [4, 32], strides = [1, 1]} : vector<4x128xf32> to vector<4x32xf32>
    %145 = vector.extract_strided_slice %142 {offsets = [0, 32], sizes = [4, 32], strides = [1, 1]} : vector<4x128xf32> to vector<4x32xf32>
    %146 = vector.extract_strided_slice %143 {offsets = [0, 64], sizes = [4, 32], strides = [1, 1]} : vector<4x128xf32> to vector<4x32xf32>
    %147 = vector.extract_strided_slice %142 {offsets = [0, 96], sizes = [4, 32], strides = [1, 1]} : vector<4x128xf32> to vector<4x32xf32>
    %148 = arith.mulf %145, %132 : vector<4x32xf32>
    %149 = arith.mulf %144, %146 : vector<4x32xf32>
    %150 = arith.addf %148, %149 : vector<4x32xf32>
    %151 = math.tanh %150 : vector<4x32xf32>
    %152 = arith.mulf %147, %151 : vector<4x32xf32>
    %153 = vector.extract_strided_slice %5 {offsets = [28, 0], sizes = [4, 128], strides = [1, 1]} : vector<32x256xf32> to vector<4x128xf32>
    %cst_25 = arith.constant dense<0.000000e+00> : vector<4x128xf32>
    %154 = tpu.matmul %152, %24, %cst_25 {dimension_numbers = #tpu.dot_dimension_numbers<[1], [0], [0], [1], [0, 0, 1, 1], [], []>} : vector<4x32xf32>, vector<32x128xf32>, vector<4x128xf32> -> vector<4x128xf32>
    %155 = arith.addf %153, %154 : vector<4x128xf32>
    %156 = arith.negf %155 : vector<4x128xf32>
    %157 = math.exp %156 : vector<4x128xf32>
    %cst_26 = arith.constant 1.000000e+00 : f32
    %158 = vector.broadcast %cst_26 : f32 to vector<4x128xf32>
    %159 = arith.addf %158, %157 : vector<4x128xf32>
    %160 = arith.divf %158, %159 : vector<4x128xf32>
    %161 = math.tanh %155 : vector<4x128xf32>
    %162 = vector.extract_strided_slice %160 {offsets = [0, 0], sizes = [4, 32], strides = [1, 1]} : vector<4x128xf32> to vector<4x32xf32>
    %163 = vector.extract_strided_slice %160 {offsets = [0, 32], sizes = [4, 32], strides = [1, 1]} : vector<4x128xf32> to vector<4x32xf32>
    %164 = vector.extract_strided_slice %161 {offsets = [0, 64], sizes = [4, 32], strides = [1, 1]} : vector<4x128xf32> to vector<4x32xf32>
    %165 = vector.extract_strided_slice %160 {offsets = [0, 96], sizes = [4, 32], strides = [1, 1]} : vector<4x128xf32> to vector<4x32xf32>
    %166 = arith.mulf %163, %150 : vector<4x32xf32>
    %167 = arith.mulf %162, %164 : vector<4x32xf32>
    %168 = arith.addf %166, %167 : vector<4x32xf32>
    %169 = math.tanh %168 : vector<4x32xf32>
    %170 = arith.mulf %165, %169 : vector<4x32xf32>
    %c0_27 = arith.constant 0 : index
    %c0_28 = arith.constant 0 : index
    %171 = vector.load %arg4[%c0_27, %c0_28] : memref<64x16xf32, #tpu.memory_space<vmem>>, vector<64x16xf32>
    %172 = vector.extract_strided_slice %171 {offsets = [0, 0], sizes = [32, 16], strides = [1, 1]} : vector<64x16xf32> to vector<32x16xf32>
    %cst_29 = arith.constant dense<0.000000e+00> : vector<4x16xf32>
    %173 = tpu.matmul %170, %172, %cst_29 {dimension_numbers = #tpu.dot_dimension_numbers<[1], [0], [0], [1], [0, 0, 1, 1], [], []>} : vector<4x32xf32>, vector<32x16xf32>, vector<4x16xf32> -> vector<4x16xf32>
    %174 = vector.extract_strided_slice %171 {offsets = [32, 0], sizes = [32, 16], strides = [1, 1]} : vector<64x16xf32> to vector<32x16xf32>
    %cst_30 = arith.constant dense<0.000000e+00> : vector<4x16xf32>
    %175 = tpu.matmul %23, %174, %cst_30 {dimension_numbers = #tpu.dot_dimension_numbers<[1], [0], [0], [1], [0, 0, 1, 1], [], []>} : vector<4x32xf32>, vector<32x16xf32>, vector<4x16xf32> -> vector<4x16xf32>
    %176 = arith.addf %173, %175 : vector<4x16xf32>
    %c0_31 = arith.constant 0 : index
    %c0_32 = arith.constant 0 : index
    %177 = vector.load %arg5[%c0_31, %c0_32] : memref<1x16xf32, #tpu.memory_space<vmem>>, vector<1x16xf32>
    %178 = vector.broadcast %177 : vector<1x16xf32> to vector<4x16xf32>
    %179 = arith.addf %176, %178 : vector<4x16xf32>
    %c0_33 = arith.constant 0 : index
    %c0_34 = arith.constant 0 : index
    %180 = vector.load %arg6[%c0_33, %c0_34] : memref<4x16xf32, #tpu.memory_space<vmem>>, vector<4x16xf32>
    tpu.vector_store %arg6[%c0_33, %c0_34], %179 {strides = array<i32>} : memref<4x16xf32, #tpu.memory_space<vmem>>, vector<4x16xf32>,
    return
  }
}

</mosaic_0001>

<bundles_post_ra>
// kernel: tpu_custom_call.1
= control target key start
LH: loop header
LB: loop body
LE: loop exit
PB: predicated region body
PF: predicated region fallthrough
CT: control target
= control target key end

     0   :  { %vm38_vm0 = vcmask 130048   ;;  %s1123_s0 = inlined_call_operand.vmem [shape: f32[32,16], index: 0, kind: input, shape index: {}]   ;;  %s1124_s1 = inlined_call_operand.vmem [shape: f32[16,256], index: 1, kind: input, shape index: {}]   ;;  %s1125_s2 = inlined_call_operand.vmem [shape: f32[1,256], index: 2, kind: input, shape index: {}]   ;;  %s1126_s3 = inlined_call_operand.vmem [shape: f32[32,128], index: 3, kind: input, shape index: {}]   ;;  %s1127_s4 = inlined_call_operand.vmem [shape: f32[64,16], index: 4, kind: input, shape index: {}]   ;;  %s1128_s5 = inlined_call_operand.vmem [shape: f32[1,16], index: 5, kind: input, shape index: {}]   ;;  %s1129_s6 = inlined_call_operand.hbm [shape: f32[4,16], index: 6, kind: output, shape index: {}]  }
   0x1   :  { %v936_v0 = vld [vmem:[%s1126_s3 + $0x18] sm:$0xff]  ;;  %v941_v1 = vld [vmem:[%s1126_s3 + $0x10] sm:$0xff]  ;;  %v28_v3 = vld [vmem:[%s1124_s1] sm:$0xff] }
   0x2   :  { %157 = vmatpush.msra.mxu2 %v936_v0  ;;  %v30_v2 = vld [vmem:[%s1124_s1 + $0x10] sm:$0xff]  ;;  %220 = vmatpush.msra.mxu3 %v936_v0  ;;  %v954_v4 = vld [vmem:[%s1126_s3 + $0x8] sm:$0xff]  ;;  %v959_v5 = vld [vmem:[%s1123_s0] sm:$0xff] }
   0x3   :  { %65 = vmatpush.msra.mxu0 %v30_v2 }
   0x4   :  { %158 = vmatpush.msra.mxu2 %v941_v1  ;;  %221 = vmatpush.msra.mxu3 %v941_v1 }
   0x5   :  { %11 = vsyncpa [#allocation3], 0  ;;  %v966_v6 = vld [vmem:[%s1126_s3] sm:$0xff]  ;;  %66 = vmatpush.msra.mxu0 %v28_v3  ;;  %v893_v7 = vmov 0.0   ;;  %s894_s12 = smov 64   ;;  %vm141_vm5 = vcmask 261120  }
   0x6   :  { %159 = vmatpush.msra.mxu2 %v954_v4  ;;  %763 = vmatmul.msk.f32.vlgmr.msra.gmra.mxu0 %vm38_vm0, %v959_v5  ;;  %v989_v8 = vld [vmem:[%s1125_s2] sm:$0x3]  ;;  %s895_s2 = smov 32   ;;  %v1011_v2 = vld [vmem:[%s1123_s0 + $0x8] sm:$0xff]  ;;  %s754_s18 = sshll.u32 %s1129_s6, 4  ;;  %s755_s18 = int_to_ptr.hbm [resolvable:$true] %s754_s18 }
   0x7   :  { %222 = vmatpush.msra.mxu3 %v954_v4  ;;  %v992_v9 = vperm.slane %v989_v8, 0 }
   0x8   :  { %160 = vmatpush.msra.mxu2 %v966_v6 }
   0x9   :  { %161 = vmatmul.f32.vlgmr.msra.gmra.mxu2 %v893_v7  ;;  %223 = vmatpush.msra.mxu3 %v966_v6 }
   0xa   :  { %290 = vmatpush.msrb.mxu2 %v936_v0 }
   0xb   :  { %356 = vmatpush.msrb.mxu3 %v936_v0 }
   0xc   :  { %291 = vmatpush.msrb.mxu2 %v941_v1 }
   0xd   :  { %357 = vmatpush.msrb.mxu3 %v941_v1 }
   0xe   :  { %292 = vmatpush.msrb.mxu2 %v954_v4  ;;  %764 = vmatmul.msk.f32.gmra.mxu0 %vm38_vm0, %v1011_v2 }
   0xf   :  { %358 = vmatpush.msrb.mxu3 %v954_v4 }
  0x10   :  { %293 = vmatpush.msrb.mxu2 %v966_v6 }
  0x11   :  { %359 = vmatpush.msrb.mxu3 %v966_v6 }
  0x12   :  { %426 = vmatpush.msra.mxu2 %v936_v0 }
  0x14   :  { %427 = vmatpush.msra.mxu2 %v941_v1 }
  0x16   :  { %428 = vmatpush.msra.mxu2 %v954_v4 }
  0x18   :  { %429 = vmatpush.msra.mxu2 %v966_v6 }
  0x83   :  { %v68_v10 = vpop.f32.mrf.mxu0 }
  0x84   :  { %v69_v11 = vadd.f32 %v68_v10, %v992_v9 }
  0x8b   :  { %v71_v7 = vpop.f32.mrf.mxu0 }
  0x8c   :  { %v162_v12 = vpop.f32.mrf.mxu2  ;;  %v72_v10 = vadd.f32 %v71_v7, %v992_v9 }
  0x8d   :  { %v165_v13 = vadd.f32 %v162_v12, %v69_v11 }
  0x8f   :  { %795 = vtanh.f32 %v165_v13  ;;  %v772_v15 = vmul.f32 -1.442695, %v165_v13 }
  0x91   :  { %797 = vpow2.f32 %v772_v15 }
  0x95   :  { %v796_v14 = vpop.eup %795 }
  0x96   :  { %188 = vrot.lane.b32.xlu0 %v796_v14, %s894_s12 }
  0x97   :  { %v798_v16 = vpop.eup %797 }
  0x98   :  { %v169_v17 = vadd.f32 1.0, %v798_v16 }
  0x9a   :  { %799 = vrcp.f32 %v169_v17  ;;  %v181_v23 = vand.u32 2147483648, %v169_v17  ;;  %vm175_vm2 = vweird.f32 %v169_v17  ;;  %v179_v24 = vand.u32 2147483647, %v169_v17 }
  0x9c   :  { %v182_v26 = vor.u32 1.1754944e-38, %v181_v23  ;;  %vm180_vm4 = vcmp.eq.f32.partialorder %v179_v24, 8.507059e+37 }
  0xa0   :  { %v800_v18 = vpop.eup %799 }
  0xa1   :  { %v171_v19 = vmul.f32 %v800_v18, %v169_v17  ;;  %vm176_vm1 = vweird.f32 %v800_v18 }
  0xa2   :  { %vm177_vm3 = vmor %vm175_vm2, %vm176_vm1 }
  0xa3   :  { %v172_v20 = vsub.f32 1.0, %v171_v19 }
  0xa5   :  { %v173_v21 = vmul.f32 %v800_v18, %v172_v20 }
  0xa7   :  { %v174_v22 = vadd.f32 %v800_v18, %v173_v21 }
  0xa9   :  { %v178_v25 = vsel %vm177_vm3, %v800_v18, %v174_v22 }
  0xaa   :  { %v183_v28 = vsel %vm180_vm4, %v182_v26, %v178_v25 }
  0xab   :  { %v186_v30 = vmul.f32 0.0, %v183_v28 }
 0x108   :  { %v189_v27 = vpop.permute.xlu0 %188 }
 0x109   :  { %v191_v29 = vmul.f32 %v189_v27, %v183_v28 }
 0x10b   :  { %193 = vrot.lane.b32.xlu0 %v191_v29, %s895_s2 }
 0x17d   :  { %v194_v31 = vpop.permute.xlu0 %193 }
 0x17e   :  { %v196_v32 = vadd.f32 %v194_v31, %v186_v30 }
 0x180   :  { %801 = vtanh.f32 %v196_v32  ;;  %v253_v56 = vrot.slane %v196_v32, 4 }
 0x186   :  { %v802_v33 = vpop.eup %801 }
 0x187   :  { %199 = vrot.lane.b32.xlu1 %v802_v33, %s894_s12 }
 0x1f9   :  { %v200_v34 = vpop.permute.xlu1 %199 }
 0x1fa   :  { %v202_v35 = vmul.f32 %v200_v34, %v183_v28 }
 0x1fc   :  { %204 = vrot.lane.b32.xlu1 %v202_v35, %s895_s2 }
 0x26e   :  { %v205_v36 = vpop.permute.xlu1 %204 }
 0x26f   :  { %773 = vmatmul.msk.f32.vlgmr.msra.gmra.mxu3 %vm141_vm5, %v205_v36 }
 0x270   :  { %492 = vmatpush.msra.mxu3 %v936_v0 }
 0x272   :  { %493 = vmatpush.msra.mxu3 %v941_v1 }
 0x274   :  { %494 = vmatpush.msra.mxu3 %v954_v4 }
 0x276   :  { %495 = vmatpush.msra.mxu3 %v966_v6 }
 0x2f2   :  { %v225_v37 = vpop.f32.mrf.mxu3 }
 0x2f3   :  { %v229_v38 = vrot.slane %v225_v37, 4 }
 0x2f5   :  { %v231_v39 = vadd.f32 %v229_v38, %v69_v11 }
 0x2f7   :  { %803 = vtanh.f32 %v231_v39  ;;  %v774_v41 = vmul.f32 -1.442695, %v231_v39 }
 0x2f9   :  { %805 = vpow2.f32 %v774_v41 }
 0x2fd   :  { %v804_v40 = vpop.eup %803 }
 0x2fe   :  { %257 = vrot.lane.b32.xlu2 %v804_v40, %s894_s12 }
 0x2ff   :  { %v806_v42 = vpop.eup %805 }
 0x300   :  { %v235_v43 = vadd.f32 1.0, %v806_v42 }
 0x302   :  { %807 = vrcp.f32 %v235_v43  ;;  %v247_v49 = vand.u32 2147483648, %v235_v43  ;;  %vm241_vm7 = vweird.f32 %v235_v43  ;;  %v245_v50 = vand.u32 2147483647, %v235_v43 }
 0x304   :  { %v248_v52 = vor.u32 1.1754944e-38, %v247_v49  ;;  %vm246_vm9 = vcmp.eq.f32.partialorder %v245_v50, 8.507059e+37 }
 0x308   :  { %v808_v44 = vpop.eup %807 }
 0x309   :  { %v237_v45 = vmul.f32 %v808_v44, %v235_v43  ;;  %vm242_vm6 = vweird.f32 %v808_v44 }
 0x30a   :  { %vm243_vm8 = vmor %vm241_vm7, %vm242_vm6 }
 0x30b   :  { %v238_v46 = vsub.f32 1.0, %v237_v45 }
 0x30d   :  { %v239_v47 = vmul.f32 %v808_v44, %v238_v46 }
 0x30f   :  { %v240_v48 = vadd.f32 %v808_v44, %v239_v47 }
 0x311   :  { %v244_v51 = vsel %vm243_vm8, %v808_v44, %v240_v48 }
 0x312   :  { %v249_v54 = vsel %vm246_vm9, %v248_v52, %v244_v51 }
 0x313   :  { %v255_v57 = vmul.f32 %v253_v56, %v249_v54 }
 0x358   :  { %v258_v53 = vpop.permute.xlu2 %257 }
 0x359   :  { %v260_v55 = vmul.f32 %v258_v53, %v249_v54 }
 0x35b   :  { %262 = vrot.lane.b32.xlu2 %v260_v55, %s895_s2 }
 0x3b5   :  { %v263_v58 = vpop.permute.xlu2 %262 }
 0x3b6   :  { %v265_v59 = vadd.f32 %v263_v58, %v255_v57 }
 0x3b8   :  { %809 = vtanh.f32 %v265_v59  ;;  %v320_v29 = vrot.slane %v265_v59, 4 }
 0x3be   :  { %v810_v60 = vpop.eup %809 }
 0x3bf   :  { %268 = vrot.lane.b32.xlu0 %v810_v60, %s894_s12  ;;  %v1037_v60 = vld [vmem:[%s1123_s0 + $0x10] sm:$0xff] }
 0x3c0   :  { %765 = vmatmul.msk.f32.gmra.mxu0 %vm38_vm0, %v1037_v60 }
 0x431   :  { %v269_v61 = vpop.permute.xlu0 %268 }
 0x432   :  { %v271_v62 = vmul.f32 %v269_v61, %v249_v54 }
 0x434   :  { %v273_v63 = vrot.slane %v271_v62, 4 }
 0x436   :  { %274 = vrot.lane.b32.xlu1 %v273_v63, %s895_s2 }
 0x43d   :  { %v74_v62 = vpop.f32.mrf.mxu0 }
 0x43e   :  { %v75_v63 = vadd.f32 %v74_v62, %v992_v9 }
 0x4a8   :  { %v275_v3 = vpop.permute.xlu1 %274 }
 0x4a9   :  { %775 = vmatmul.msk.f32.vlgmr.msrb.gmra.mxu2 %vm141_vm5, %v275_v3 }
 0x4aa   :  { %562 = vmatpush.msrb.mxu2 %v936_v0 }
 0x4ac   :  { %563 = vmatpush.msrb.mxu2 %v941_v1 }
 0x4ae   :  { %564 = vmatpush.msrb.mxu2 %v954_v4 }
 0x4b0   :  { %565 = vmatpush.msrb.mxu2 %v966_v6 }
 0x52c   :  { %v295_v11 = vpop.f32.mrf.mxu2 }
 0x52d   :  { %v298_v12 = vadd.f32 %v295_v11, %v72_v10 }
 0x52f   :  { %811 = vtanh.f32 %v298_v12  ;;  %v776_v14 = vmul.f32 -1.442695, %v298_v12 }
 0x531   :  { %813 = vpow2.f32 %v776_v14 }
 0x535   :  { %v812_v13 = vpop.eup %811 }
 0x536   :  { %324 = vrot.lane.b32.xlu2 %v812_v13, %s894_s12 }
 0x537   :  { %v814_v15 = vpop.eup %813 }
 0x538   :  { %v302_v16 = vadd.f32 1.0, %v814_v15 }
 0x53a   :  { %815 = vrcp.f32 %v302_v16  ;;  %v314_v22 = vand.u32 2147483648, %v302_v16  ;;  %vm308_vm11 = vweird.f32 %v302_v16  ;;  %v312_v23 = vand.u32 2147483647, %v302_v16 }
 0x53c   :  { %v315_v25 = vor.u32 1.1754944e-38, %v314_v22  ;;  %vm313_vm13 = vcmp.eq.f32.partialorder %v312_v23, 8.507059e+37 }
 0x540   :  { %v816_v17 = vpop.eup %815 }
 0x541   :  { %v304_v18 = vmul.f32 %v816_v17, %v302_v16  ;;  %vm309_vm10 = vweird.f32 %v816_v17 }
 0x542   :  { %vm310_vm12 = vmor %vm308_vm11, %vm309_vm10 }
 0x543   :  { %v305_v19 = vsub.f32 1.0, %v304_v18 }
 0x545   :  { %v306_v20 = vmul.f32 %v816_v17, %v305_v19 }
 0x547   :  { %v307_v21 = vadd.f32 %v816_v17, %v306_v20 }
 0x549   :  { %v311_v24 = vsel %vm310_vm12, %v816_v17, %v307_v21 }
 0x54a   :  { %v316_v27 = vsel %vm313_vm13, %v315_v25, %v311_v24 }
 0x54b   :  { %v322_v30 = vmul.f32 %v320_v29, %v316_v27 }
 0x590   :  { %v325_v26 = vpop.permute.xlu2 %324 }
 0x591   :  { %v327_v28 = vmul.f32 %v325_v26, %v316_v27 }
 0x593   :  { %329 = vrot.lane.b32.xlu0 %v327_v28, %s895_s2 }
 0x605   :  { %v330_v31 = vpop.permute.xlu0 %329 }
 0x606   :  { %v332_v32 = vadd.f32 %v330_v31, %v322_v30 }
 0x608   :  { %817 = vtanh.f32 %v332_v32  ;;  %v389_v52 = vrot.slane %v332_v32, 4 }
 0x60e   :  { %v818_v33 = vpop.eup %817 }
 0x60f   :  { %335 = vrot.lane.b32.xlu1 %v818_v33, %s894_s12 }
 0x681   :  { %v336_v34 = vpop.permute.xlu1 %335 }
 0x682   :  { %v338_v35 = vmul.f32 %v336_v34, %v316_v27 }
 0x684   :  { %340 = vrot.lane.b32.xlu2 %v338_v35, %s895_s2 }
 0x6de   :  { %v341_v36 = vpop.permute.xlu2 %340 }
 0x6df   :  { %777 = vmatmul.msk.f32.vlgmr.msrb.gmra.mxu3 %vm141_vm5, %v341_v36 }
 0x6e0   :  { %628 = vmatpush.msrb.mxu3 %v936_v0 }
 0x6e2   :  { %629 = vmatpush.msrb.mxu3 %v941_v1 }
 0x6e4   :  { %630 = vmatpush.msrb.mxu3 %v954_v4 }
 0x6e6   :  { %631 = vmatpush.msrb.mxu3 %v966_v6 }
 0x762   :  { %v361_v37 = vpop.f32.mrf.mxu3 }
 0x763   :  { %v365_v38 = vrot.slane %v361_v37, 4 }
 0x765   :  { %v367_v39 = vadd.f32 %v365_v38, %v72_v10 }
 0x767   :  { %819 = vtanh.f32 %v367_v39  ;;  %v778_v41 = vmul.f32 -1.442695, %v367_v39 }
 0x769   :  { %821 = vpow2.f32 %v778_v41 }
 0x76d   :  { %v820_v40 = vpop.eup %819 }
 0x76e   :  { %393 = vrot.lane.b32.xlu0 %v820_v40, %s894_s12 }
 0x76f   :  { %v822_v42 = vpop.eup %821 }
 0x770   :  { %v371_v43 = vadd.f32 1.0, %v822_v42 }
 0x772   :  { %823 = vrcp.f32 %v371_v43  ;;  %v383_v4 = vand.u32 2147483648, %v371_v43  ;;  %vm377_vm15 = vweird.f32 %v371_v43  ;;  %v381_v6 = vand.u32 2147483647, %v371_v43 }
 0x774   :  { %v384_v48 = vor.u32 1.1754944e-38, %v383_v4  ;;  %vm382_vm2 = vcmp.eq.f32.partialorder %v381_v6, 8.507059e+37 }
 0x778   :  { %v824_v44 = vpop.eup %823 }
 0x779   :  { %v373_v0 = vmul.f32 %v824_v44, %v371_v43  ;;  %vm378_vm14 = vweird.f32 %v824_v44 }
 0x77a   :  { %vm379_vm1 = vmor %vm377_vm15, %vm378_vm14 }
 0x77b   :  { %v374_v45 = vsub.f32 1.0, %v373_v0 }
 0x77d   :  { %v375_v1 = vmul.f32 %v824_v44, %v374_v45 }
 0x77f   :  { %v376_v46 = vadd.f32 %v824_v44, %v375_v1 }
 0x781   :  { %v380_v47 = vsel %vm379_vm1, %v824_v44, %v376_v46 }
 0x782   :  { %v385_v50 = vsel %vm382_vm2, %v384_v48, %v380_v47 }
 0x783   :  { %v391_v53 = vmul.f32 %v389_v52, %v385_v50 }
 0x7e0   :  { %v394_v49 = vpop.permute.xlu0 %393 }
 0x7e1   :  { %v396_v51 = vmul.f32 %v394_v49, %v385_v50 }
 0x7e3   :  { %398 = vrot.lane.b32.xlu1 %v396_v51, %s895_s2 }
 0x855   :  { %v399_v54 = vpop.permute.xlu1 %398 }
 0x856   :  { %v401_v55 = vadd.f32 %v399_v54, %v391_v53 }
 0x858   :  { %825 = vtanh.f32 %v401_v55  ;;  %v456_v26 = vrot.slane %v401_v55, 4 }
 0x85e   :  { %v826_v56 = vpop.eup %825 }
 0x85f   :  { %404 = vrot.lane.b32.xlu2 %v826_v56, %s894_s12 }
 0x8b9   :  { %v405_v57 = vpop.permute.xlu2 %404 }
 0x8ba   :  { %v407_v58 = vmul.f32 %v405_v57, %v385_v50  ;;  %v27_v57 = vld [vmem:[%s1123_s0 + $0x18] sm:$0xff] }
 0x8bb   :  { %766 = vmatmul.msk.f32.gmra.mxu0 %vm38_vm0, %v27_v57 }
 0x8bc   :  { %v409_v59 = vrot.slane %v407_v58, 4 }
 0x8be   :  { %410 = vrot.lane.b32.xlu0 %v409_v59, %s895_s2 }
 0x930   :  { %v411_v61 = vpop.permute.xlu0 %410 }
 0x931   :  { %779 = vmatmul.msk.f32.vlgmr.msra.gmra.mxu2 %vm141_vm5, %v411_v61 }
 0x938   :  { %v77_v59 = vpop.f32.mrf.mxu0 }
 0x939   :  { %v1058_v61 = vadd.f32 %v77_v59, %v992_v9 }
 0x9b4   :  { %v431_v3 = vpop.f32.mrf.mxu2 }
 0x9b5   :  { %v434_v7 = vadd.f32 %v431_v3, %v75_v63 }
 0x9b7   :  { %827 = vtanh.f32 %v434_v7  ;;  %v780_v11 = vmul.f32 -1.442695, %v434_v7 }
 0x9b9   :  { %829 = vpow2.f32 %v780_v11 }
 0x9bd   :  { %v828_v10 = vpop.eup %827 }
 0x9be   :  { %460 = vrot.lane.b32.xlu1 %v828_v10, %s894_s12 }
 0x9bf   :  { %v830_v12 = vpop.eup %829 }
 0x9c0   :  { %v438_v13 = vadd.f32 1.0, %v830_v12 }
 0x9c2   :  { %831 = vrcp.f32 %v438_v13  ;;  %v450_v19 = vand.u32 2147483648, %v438_v13  ;;  %vm444_vm4 = vweird.f32 %v438_v13  ;;  %v448_v20 = vand.u32 2147483647, %v438_v13 }
 0x9c4   :  { %v451_v22 = vor.u32 1.1754944e-38, %v450_v19  ;;  %vm449_vm7 = vcmp.eq.f32.partialorder %v448_v20, 8.507059e+37 }
 0x9c8   :  { %v832_v14 = vpop.eup %831 }
 0x9c9   :  { %v440_v15 = vmul.f32 %v832_v14, %v438_v13  ;;  %vm445_vm3 = vweird.f32 %v832_v14 }
 0x9ca   :  { %vm446_vm6 = vmor %vm444_vm4, %vm445_vm3 }
 0x9cb   :  { %v441_v16 = vsub.f32 1.0, %v440_v15 }
 0x9cd   :  { %v442_v17 = vmul.f32 %v832_v14, %v441_v16 }
 0x9cf   :  { %v443_v18 = vadd.f32 %v832_v14, %v442_v17 }
 0x9d1   :  { %v447_v21 = vsel %vm446_vm6, %v832_v14, %v443_v18 }
 0x9d2   :  { %v452_v24 = vsel %vm449_vm7, %v451_v22, %v447_v21 }
 0x9d3   :  { %v458_v27 = vmul.f32 %v456_v26, %v452_v24 }
 0xa30   :  { %v461_v23 = vpop.permute.xlu1 %460 }
 0xa31   :  { %v463_v25 = vmul.f32 %v461_v23, %v452_v24 }
 0xa33   :  { %465 = vrot.lane.b32.xlu2 %v463_v25, %s895_s2 }
 0xa8d   :  { %v466_v28 = vpop.permute.xlu2 %465 }
 0xa8e   :  { %v468_v29 = vadd.f32 %v466_v28, %v458_v27  ;;  %v31_v28 = vld [vmem:[%s1124_s1 + $0x18] sm:$0xff] }
 0xa8f   :  { %94 = vmatpush.msra.mxu1 %v31_v28  ;;  %v683_v28 = vld [vmem:[%s1127_s4 + $0x18] sm:$0xff] }
 0xa90   :  { %833 = vtanh.f32 %v468_v29  ;;  %v525_v49 = vrot.slane %v468_v29, 4  ;;  %v29_v29 = vld [vmem:[%s1124_s1 + $0x8] sm:$0xff]  ;;  %s896_s1 = smov 96  }
 0xa91   :  { %95 = vmatpush.msra.mxu1 %v29_v29  ;;  %v681_v29 = vld [vmem:[%s1127_s4 + $0x8] sm:$0xff] }
 0xa92   :  { %767 = vmatmul.msk.f32.vlgmr.msra.gmra.mxu1 %vm38_vm0, %v959_v5  ;;  %v35_v5 = vperm.slane %v989_v8, 1 }
 0xa93   :  { %732 = vmatpush.msrb.mxu1 %v683_v28 }
 0xa96   :  { %v834_v30 = vpop.eup %833 }
 0xa97   :  { %471 = vrot.lane.b32.xlu0 %v834_v30, %s894_s12 }
 0xa9a   :  { %768 = vmatmul.msk.f32.gmra.mxu1 %vm38_vm0, %v1011_v2 }
 0xaa2   :  { %769 = vmatmul.msk.f32.gmra.mxu1 %vm38_vm0, %v1037_v60 }
 0xaaa   :  { %770 = vmatmul.msk.f32.gmra.mxu1 %vm38_vm0, %v27_v57 }
 0xb09   :  { %v472_v31 = vpop.permute.xlu0 %471 }
 0xb0a   :  { %v474_v32 = vmul.f32 %v472_v31, %v452_v24 }
 0xb0c   :  { %476 = vrot.lane.b32.xlu1 %v474_v32, %s895_s2 }
 0xb0f   :  { %v97_v32 = vpop.f32.mrf.mxu1 }
 0xb10   :  { %v794_v32 = vld [vmem:[%s1128_s5] ss:$0 sm:$0xff] }
 0xb7e   :  { %v477_v33 = vpop.permute.xlu1 %476 }
 0xb7f   :  { %781 = vmatmul.msk.f32.vlgmr.msra.gmra.mxu3 %vm141_vm5, %v477_v33  ;;  %v99_v33 = vpop.f32.mrf.mxu1 }
 0xc02   :  { %v497_v34 = vpop.f32.mrf.mxu3 }
 0xc03   :  { %v501_v35 = vrot.slane %v497_v34, 4  ;;  %v101_v34 = vpop.f32.mrf.mxu1 }
 0xc05   :  { %v503_v36 = vadd.f32 %v501_v35, %v75_v63 }
 0xc07   :  { %835 = vtanh.f32 %v503_v36  ;;  %v782_v38 = vmul.f32 -1.442695, %v503_v36 }
 0xc09   :  { %837 = vpow2.f32 %v782_v38 }
 0xc0b   :  { %v103_v36 = vpop.f32.mrf.mxu1 }
 0xc0d   :  { %v836_v37 = vpop.eup %835 }
 0xc0e   :  { %529 = vrot.lane.b32.xlu2 %v836_v37, %s894_s12  ;;  %v104_v37 = vadd.f32 %v103_v36, %v35_v5 }
 0xc0f   :  { %v838_v39 = vpop.eup %837 }
 0xc10   :  { %v507_v40 = vadd.f32 1.0, %v838_v39  ;;  %v771_v60 = vmul.f32 -1.442695, %v104_v37 }
 0xc12   :  { %839 = vrcp.f32 %v507_v40  ;;  %v519_v45 = vand.u32 2147483648, %v507_v40  ;;  %vm513_vm9 = vweird.f32 %v507_v40  ;;  %v517_v1 = vand.u32 2147483647, %v507_v40 }
 0xc14   :  { %v520_v4 = vor.u32 1.1754944e-38, %v519_v45  ;;  %vm518_vm11 = vcmp.eq.f32.partialorder %v517_v1, 8.507059e+37 }
 0xc18   :  { %v840_v41 = vpop.eup %839 }
 0xc19   :  { %v509_v42 = vmul.f32 %v840_v41, %v507_v40  ;;  %vm514_vm8 = vweird.f32 %v840_v41 }
 0xc1a   :  { %vm515_vm10 = vmor %vm513_vm9, %vm514_vm8  ;;  %vm745_vm9 = vcmask 125952  }
 0xc1b   :  { %v510_v43 = vsub.f32 1.0, %v509_v42 }
 0xc1d   :  { %v511_v44 = vmul.f32 %v840_v41, %v510_v43 }
 0xc1f   :  { %v512_v0 = vadd.f32 %v840_v41, %v511_v44 }
 0xc21   :  { %v516_v46 = vsel %vm515_vm10, %v840_v41, %v512_v0 }
 0xc22   :  { %v521_v47 = vsel %vm518_vm11, %v520_v4, %v516_v46 }
 0xc23   :  { %v527_v50 = vmul.f32 %v525_v49, %v521_v47 }
 0xc68   :  { %v530_v6 = vpop.permute.xlu2 %529 }
 0xc69   :  { %v532_v48 = vmul.f32 %v530_v6, %v521_v47 }
 0xc6b   :  { %534 = vrot.lane.b32.xlu0 %v532_v48, %s895_s2 }
 0xcdd   :  { %v535_v51 = vpop.permute.xlu0 %534 }
 0xcde   :  { %v537_v52 = vadd.f32 %v535_v51, %v527_v50 }
 0xce0   :  { %841 = vtanh.f32 %v537_v52  ;;  %v592_v23 = vrot.slane %v537_v52, 4 }
 0xce6   :  { %v842_v53 = vpop.eup %841 }
 0xce7   :  { %540 = vrot.lane.b32.xlu1 %v842_v53, %s894_s12 }
 0xd59   :  { %v541_v54 = vpop.permute.xlu1 %540 }
 0xd5a   :  { %v543_v55 = vmul.f32 %v541_v54, %v521_v47 }
 0xd5c   :  { %v545_v56 = vrot.slane %v543_v55, 4 }
 0xd5e   :  { %546 = vrot.lane.b32.xlu2 %v545_v56, %s895_s2 }
 0xdb8   :  { %v547_v58 = vpop.permute.xlu2 %546 }
 0xdb9   :  { %783 = vmatmul.msk.f32.vlgmr.msrb.gmra.mxu2 %vm141_vm5, %v547_v58 }
 0xe3c   :  { %v567_v62 = vpop.f32.mrf.mxu2 }
 0xe3d   :  { %v570_v63 = vadd.f32 %v567_v62, %v1058_v61 }
 0xe3f   :  { %843 = vtanh.f32 %v570_v63  ;;  %v784_v7 = vmul.f32 -1.442695, %v570_v63 }
 0xe41   :  { %845 = vpow2.f32 %v784_v7 }
 0xe45   :  { %v844_v3 = vpop.eup %843 }
 0xe46   :  { %596 = vrot.lane.b32.xlu0 %v844_v3, %s894_s12 }
 0xe47   :  { %v846_v10 = vpop.eup %845 }
 0xe48   :  { %v574_v11 = vadd.f32 1.0, %v846_v10 }
 0xe4a   :  { %847 = vrcp.f32 %v574_v11  ;;  %v586_v9 = vand.u32 2147483648, %v574_v11  ;;  %vm580_vm13 = vweird.f32 %v574_v11  ;;  %v584_v17 = vand.u32 2147483647, %v574_v11 }
 0xe4c   :  { %v587_v19 = vor.u32 1.1754944e-38, %v586_v9  ;;  %vm585_vm15 = vcmp.eq.f32.partialorder %v584_v17, 8.507059e+37  ;;  %v685_v9 = vld [vmem:[%s1127_s4 + $0x28] sm:$0xff]  ;;  %v684_v17 = vld [vmem:[%s1127_s4 + $0x20] sm:$0xff] }
 0xe50   :  { %v848_v12 = vpop.eup %847 }
 0xe51   :  { %v576_v13 = vmul.f32 %v848_v12, %v574_v11  ;;  %vm581_vm12 = vweird.f32 %v848_v12 }
 0xe52   :  { %vm582_vm14 = vmor %vm580_vm13, %vm581_vm12 }
 0xe53   :  { %v577_v14 = vsub.f32 1.0, %v576_v13 }
 0xe55   :  { %v578_v15 = vmul.f32 %v848_v12, %v577_v14 }
 0xe57   :  { %v579_v16 = vadd.f32 %v848_v12, %v578_v15  ;;  %v687_v15 = vld [vmem:[%s1127_s4 + $0x38] sm:$0xff] }
 0xe58   :  { %706 = vmatpush.msrb.mxu0 %v687_v15 }
 0xe59   :  { %v583_v18 = vsel %vm582_vm14, %v848_v12, %v579_v16  ;;  %v686_v16 = vld [vmem:[%s1127_s4 + $0x30] sm:$0xff] }
 0xe5a   :  { %v588_v21 = vsel %vm585_vm15, %v587_v19, %v583_v18  ;;  %707 = vmatpush.msrb.mxu0 %v686_v16 }
 0xe5b   :  { %v594_v24 = vmul.f32 %v592_v23, %v588_v21 }
 0xe5c   :  { %708 = vmatpush.msrb.mxu0 %v685_v9 }
 0xe5e   :  { %709 = vmatpush.msrb.mxu0 %v684_v17 }
 0xeb8   :  { %v597_v20 = vpop.permute.xlu0 %596 }
 0xeb9   :  { %v599_v22 = vmul.f32 %v597_v20, %v588_v21 }
 0xebb   :  { %601 = vrot.lane.b32.xlu1 %v599_v22, %s895_s2 }
 0xf2d   :  { %v602_v25 = vpop.permute.xlu1 %601 }
 0xf2e   :  { %v1063_v26 = vadd.f32 %v602_v25, %v594_v24 }
 0xf30   :  { %849 = vtanh.f32 %v1063_v26  ;;  %v661_v18 = vrot.slane %v1063_v26, 4  ;;  %v682_v26 = vld [vmem:[%s1127_s4 + $0x10] sm:$0xff] }
 0xf31   :  { %851 = vtanh.f32 %v104_v37  ;;  %733 = vmatpush.msrb.mxu1 %v682_v26 }
 0xf32   :  { %853 = vpow2.f32 %v771_v60 }
 0xf33   :  { %734 = vmatpush.msrb.mxu1 %v681_v29 }
 0xf36   :  { %v850_v27 = vpop.eup %849 }
 0xf37   :  { %607 = vrot.lane.b32.xlu2 %v850_v27, %s894_s12  ;;  %v852_v2 = vpop.eup %851 }
 0xf38   :  { %v854_v38 = vpop.eup %853 }
 0xf39   :  { %v109_v39 = vadd.f32 1.0, %v854_v38 }
 0xf3b   :  { %855 = vrcp.f32 %v109_v39  ;;  %vm115_vm0 = vweird.f32 %v109_v39  ;;  %v121_v44 = vand.u32 2147483648, %v109_v39  ;;  %v119_v8 = vand.u32 2147483647, %v109_v39 }
 0xf3d   :  { %v122_v1 = vor.u32 1.1754944e-38, %v121_v44  ;;  %vm120_vm3 = vcmp.eq.f32.partialorder %v119_v8, 8.507059e+37 }
 0xf3f   :  { %127 = vrot.lane.b32.xlu2 %v852_v2, %s894_s12 }
 0xf41   :  { %v856_v40 = vpop.eup %855 }
 0xf42   :  { %v111_v41 = vmul.f32 %v856_v40, %v109_v39  ;;  %vm116_vm1 = vweird.f32 %v856_v40 }
 0xf43   :  { %vm117_vm2 = vmor %vm115_vm0, %vm116_vm1 }
 0xf44   :  { %v112_v42 = vsub.f32 1.0, %v111_v41 }
 0xf46   :  { %v113_v43 = vmul.f32 %v856_v40, %v112_v42 }
 0xf48   :  { %v114_v0 = vadd.f32 %v856_v40, %v113_v43 }
 0xf4a   :  { %v118_v4 = vsel %vm117_vm2, %v856_v40, %v114_v0 }
 0xf4b   :  { %v123_v47 = vsel %vm120_vm3, %v122_v1, %v118_v4 }
 0xf91   :  { %v608_v30 = vpop.permute.xlu2 %607 }
 0xf92   :  { %v610_v31 = vmul.f32 %v608_v30, %v588_v21  ;;  %v680_v30 = vld [vmem:[%s1127_s4] sm:$0xff] }
 0xf93   :  { %735 = vmatpush.msrb.mxu1 %v680_v30 }
 0xf94   :  { %612 = vrot.lane.b32.xlu0 %v610_v31, %s895_s2 }
 0xf99   :  { %v128_v48 = vpop.permute.xlu2 %127 }
 0xf9a   :  { %v130_v49 = vmul.f32 %v128_v48, %v123_v47 }
0x1006   :  { %v613_v35 = vpop.permute.xlu0 %612 }
0x1007   :  { %785 = vmatmul.msk.f32.vlgmr.msrb.gmra.mxu3 %vm141_vm5, %v613_v35 }
0x108a   :  { %v633_v45 = vpop.f32.mrf.mxu3 }
0x108b   :  { %v637_v46 = vrot.slane %v633_v45, 4 }
0x108d   :  { %v639_v6 = vadd.f32 %v637_v46, %v1058_v61 }
0x108f   :  { %857 = vtanh.f32 %v639_v6  ;;  %v786_v52 = vmul.f32 -1.442695, %v639_v6 }
0x1090   :  { %859 = vtanh.f32 %v130_v49 }
0x1091   :  { %861 = vpow2.f32 %v786_v52 }
0x1095   :  { %v858_v50 = vpop.eup %857 }
0x1096   :  { %665 = vrot.lane.b32.xlu1 %v858_v50, %s894_s12  ;;  %v860_v51 = vpop.eup %859 }
0x1097   :  { %v862_v53 = vpop.eup %861 }
0x1098   :  { %v643_v54 = vadd.f32 1.0, %v862_v53 }
0x109a   :  { %863 = vrcp.f32 %v643_v54  ;;  %v655_v61 = vand.u32 2147483648, %v643_v54  ;;  %vm649_vm6 = vweird.f32 %v643_v54  ;;  %v653_v62 = vand.u32 2147483647, %v643_v54 }
0x109c   :  { %v656_v3 = vor.u32 1.1754944e-38, %v655_v61  ;;  %vm654_vm8 = vcmp.eq.f32.partialorder %v653_v62, 8.507059e+37 }
0x109e   :  { %133 = vrot.lane.b32.xlu1 %v860_v51, %s896_s1 }
0x10a0   :  { %v864_v55 = vpop.eup %863 }
0x10a1   :  { %v645_v56 = vmul.f32 %v864_v55, %v643_v54  ;;  %vm650_vm4 = vweird.f32 %v864_v55 }
0x10a2   :  { %vm651_vm7 = vmor %vm649_vm6, %vm650_vm4 }
0x10a3   :  { %v646_v57 = vsub.f32 1.0, %v645_v56 }
0x10a5   :  { %v647_v58 = vmul.f32 %v864_v55, %v646_v57 }
0x10a7   :  { %v648_v59 = vadd.f32 %v864_v55, %v647_v58 }
0x10a9   :  { %v652_v63 = vsel %vm651_vm7, %v864_v55, %v648_v59 }
0x10aa   :  { %v657_v10 = vsel %vm654_vm8, %v656_v3, %v652_v63 }
0x10ab   :  { %v663_v19 = vmul.f32 %v661_v18, %v657_v10 }
0x1108   :  { %v666_v7 = vpop.permute.xlu1 %665 }
0x1109   :  { %v668_v11 = vmul.f32 %v666_v7, %v657_v10 }
0x110b   :  { %670 = vrot.lane.b32.xlu0 %v668_v11, %s895_s2 }
0x1110   :  { %v134_v12 = vpop.permute.xlu1 %133 }
0x1111   :  { %v136_v13 = vmul.f32 %v134_v12, %v123_v47 }
0x1113   :  { %v689_v14 = vrot.slane %v136_v13, 4 }
0x1115   :  { %690 = vrot.lane.b32.xlu0 %v689_v14, %s895_s2 }
0x117d   :  { %v671_v20 = vpop.permute.xlu0 %670 }
0x117e   :  { %v673_v21 = vadd.f32 %v671_v20, %v663_v19 }
0x1180   :  { %865 = vtanh.f32 %v673_v21 }
0x1186   :  { %v866_v22 = vpop.eup %865 }
0x1187   :  { %676 = vrot.lane.b32.xlu2 %v866_v22, %s894_s12  ;;  %v691_v23 = vpop.permute.xlu0 %690 }
0x1188   :  { %787 = vmatmul.msk.f32.vlgmr.msrb.gmra.mxu0 %vm141_vm5, %v691_v23 }
0x11e1   :  { %v677_v24 = vpop.permute.xlu2 %676 }
0x11e2   :  { %v679_v25 = vmul.f32 %v677_v24, %v657_v10 }
0x11e4   :  { %v715_v27 = vrot.slane %v679_v25, 4 }
0x11e6   :  { %716 = vrot.lane.b32.xlu1 %v715_v27, %s895_s2  ;;  %s897_s2 = smov [#allocation2]  }
0x11e7   :  { %s752_s15 = sshll.u32 %s897_s2, 4  ;;  %s753_s15 = int_to_ptr.vmem [resolvable:$true] %s752_s15 }
0x1205   :  { %v711_v33 = vpop.f32.mrf.mxu0 }
0x1258   :  { %v717_v31 = vpop.permute.xlu1 %716 }
0x1259   :  { %788 = vmatmul.msk.f32.vlgmr.msrb.gmra.mxu1 %vm141_vm5, %v717_v31 }
0x12d6   :  { %v737_v34 = vpop.f32.mrf.mxu1 }
0x12d7   :  { %v738_v35 = vadd.f32 %v737_v34, %v711_v33 }
0x12d9   :  { %v744_v5 = vadd.f32 %v794_v32, %v738_v35 }
0x12db   :  { %746 = vst.msk [vmem:[#allocation2] sm:$0xf] %vm745_vm9, %v744_v5 }
0x12dc   :  { %757 = dma.vmem_to_hbm [thread:$0]  %s753_s15, 64, %s755_s18, [#allocation3]  }
0x12dd   :  { %891 = dma.done.wait [#allocation3], 64  }
0x12de   :  { %892 = vsyncadd [#allocation3], 4294967232 }
0x12df   :  { %762 = vsyncpa [#allocation3], 1 }

</bundles_post_ra>
